<compile_context>
chip_gen: v5e
topology: v5e:2x2
jax: 0.10.0
libtpu: 0.0.40
codegen_flags: <defaults>
</compile_context>

<pallas_src>
import jax
import jax.numpy as jnp
from jax.experimental import pallas as pl
from jax.experimental.pallas import tpu as pltpu


def toy_mlp_kernel(x_ref, w1_ref, b1_ref, w2_ref, b2_ref, o_ref):
    # x_ref: (TB, 10), w1_ref: (10, 10), b1_ref: (1, 10),
    # w2_ref: (10, 5), b2_ref: (1, 5), o_ref: (TB, 5).
    x = x_ref[...]                                            # (TB, 10) f32
    h = jnp.dot(x, w1_ref[...],
                preferred_element_type=jnp.float32)           # (TB, 10)  MXU
    h = jnp.maximum(h + b1_ref[...], 0.0)                     # bias + ReLU (VPU)
    y = jnp.dot(h, w2_ref[...],
                preferred_element_type=jnp.float32)           # (TB, 5)   MXU
    o_ref[...] = (y + b2_ref[...]).astype(o_ref.dtype)


def _round8(n):
    return ((n + 7) // 8) * 8


def _choose_tiling(B, block_b):
    """Pick (TB, Bp): batch tile (multiple of 8) and padded batch size."""
    B8 = _round8(B)
    if B8 <= 256:
        # Tiny batch: one block, no pipeline machinery, no padded copy of x.
        return B8, B8
    # Want >= 2 grid steps (v7x megacore) and TB as large as possible <= block_b.
    cap = min(block_b, _round8(B8 // 2))
    cap -= cap % 8
    cap = max(cap, 8)
    # Prefer a multiple-of-8 divisor of B8: avoids materializing a padded copy of x.
    for d in range(cap, 7, -8):
        if B8 % d == 0:
            if d * 8 >= cap:        # big enough that per-step overhead stays amortized
                return d, B8
            break
    # Fallback: pad batch to a multiple of cap (one extra copy of x, rare shapes only).
    TB = cap
    Bp = ((B8 + TB - 1) // TB) * TB
    return TB, Bp


def toy_model_forward(x, w1, b1, w2, b2, *, block_b=8192):
    B, K = x.shape                 # (batch, 10)
    H = w1.shape[1]                # 10
    N = w2.shape[1]                # 5

    TB, Bp = _choose_tiling(B, block_b)
    xp = x if Bp == B else jnp.pad(x, ((0, Bp - B), (0, 0)))
    grid = (Bp // TB,)

    cost = pl.CostEstimate(
        flops=2 * Bp * (K * H + H * N),
        transcendentals=0,
        bytes_accessed=4 * (Bp * K + w1.size + b1.size + w2.size + b2.size
                            + Bp * N),
    )

    out_padded = pl.pallas_call(
        toy_mlp_kernel,
        out_shape=jax.ShapeDtypeStruct((Bp, N), jnp.float32),
        grid_spec=pltpu.PrefetchScalarGridSpec(
            num_scalar_prefetch=0,
            grid=grid,
            in_specs=[
                pl.BlockSpec((TB, K), lambda i: (i, 0)),   # x: batch-tiled
                pl.BlockSpec((K, H), lambda i: (0, 0)),    # w1: VMEM-resident
                pl.BlockSpec((1, H), lambda i: (0, 0)),    # b1: VMEM-resident
                pl.BlockSpec((H, N), lambda i: (0, 0)),    # w2: VMEM-resident
                pl.BlockSpec((1, N), lambda i: (0, 0)),    # b2: VMEM-resident
            ],
            out_specs=pl.BlockSpec((TB, N), lambda i: (i, 0)),
        ),
        compiler_params=pltpu.CompilerParams(
            dimension_semantics=("parallel",),  # v7x: shard batch tiles across 2 TCs
        ),
        cost_estimate=cost,
    )(xp, w1, b1, w2, b2)

    return out_padded if Bp == B else out_padded[:B]


def init_params(key):
    # Deterministic init mimicking nn.Linear's U(-1/sqrt(fan_in), 1/sqrt(fan_in)).
    k1, k2, k3, k4 = jax.random.split(key, 4)
    bound1 = 1.0 / jnp.sqrt(10.0)
    bound2 = 1.0 / jnp.sqrt(10.0)
    w1 = jax.random.uniform(k1, (10, 10), jnp.float32, -bound1, bound1)  # (in, out)
    b1 = jax.random.uniform(k2, (1, 10), jnp.float32, -bound1, bound1)
    w2 = jax.random.uniform(k3, (10, 5), jnp.float32, -bound2, bound2)   # (in, out)
    b2 = jax.random.uniform(k4, (1, 5), jnp.float32, -bound2, bound2)
    return w1, b1, w2, b2


if __name__ == "__main__":
    key = jax.random.PRNGKey(0)
    x_key, param_key = jax.random.split(key)
    B = 8
    x = jax.random.normal(x_key, (B, 10), dtype=jnp.float32)
    w1, b1, w2, b2 = init_params(param_key)

    out = toy_model_forward(x, w1, b1, w2, b2)
    jax.block_until_ready(out)

    # Reference check in plain JAX (same semantics as the PyTorch forward).
    ref = jnp.maximum(x @ w1 + b1, 0.0) @ w2 + b2
    assert out.shape == (B, 5)
    assert jnp.allclose(out, ref, atol=1e-5, rtol=1e-5)
    print("KERNEL_OK")
</pallas_src>

<mosaic_0001>
module attributes {stable_mosaic.version = 11 : i64} {
  func.func @toy_mlp_kernel(%arg0: i32, %arg1: memref<8x10xf32, #tpu.memory_space<vmem>>, %arg2: memref<10x10xf32, #tpu.memory_space<vmem>>, %arg3: memref<1x10xf32, #tpu.memory_space<vmem>>, %arg4: memref<10x5xf32, #tpu.memory_space<vmem>>, %arg5: memref<1x5xf32, #tpu.memory_space<vmem>>, %arg6: memref<8x5xf32, #tpu.memory_space<vmem>>) attributes {dimension_semantics = [#tpu.dimension_semantics<parallel>], iteration_bounds = array<i64: 1>, scalar_prefetch = 0 : i64, scratch_operands = 0 : i64, tpu.core_type = #tpu.core_type<tc>, window_params = [{transform_indices = @transform_0, window_bounds = array<i64: 8, 10>}, {pipeline_mode = #tpu.pipeline_mode<synchronous>, transform_indices = @transform_1, window_bounds = array<i64: 10, 10>}, {pipeline_mode = #tpu.pipeline_mode<synchronous>, transform_indices = @transform_2, window_bounds = array<i64: 1, 10>}, {pipeline_mode = #tpu.pipeline_mode<synchronous>, transform_indices = @transform_3, window_bounds = array<i64: 10, 5>}, {pipeline_mode = #tpu.pipeline_mode<synchronous>, transform_indices = @transform_4, window_bounds = array<i64: 1, 5>}, {transform_indices = @transform_5, window_bounds = array<i64: 8, 5>}]} {
    %c0 = arith.constant 0 : index
    %c0_0 = arith.constant 0 : index
    %0 = vector.load %arg1[%c0, %c0_0] : memref<8x10xf32, #tpu.memory_space<vmem>>, vector<8x10xf32>
    %c0_1 = arith.constant 0 : index
    %c0_2 = arith.constant 0 : index
    %1 = vector.load %arg2[%c0_1, %c0_2] : memref<10x10xf32, #tpu.memory_space<vmem>>, vector<10x10xf32>
    %cst = arith.constant dense<0.000000e+00> : vector<8x10xf32>
    %2 = tpu.matmul %0, %1, %cst {dimension_numbers = #tpu.dot_dimension_numbers<[1], [0], [0], [1], [0, 0, 1, 1], [], []>} : vector<8x10xf32>, vector<10x10xf32>, vector<8x10xf32> -> vector<8x10xf32>
    %c0_3 = arith.constant 0 : index
    %c0_4 = arith.constant 0 : index
    %3 = vector.load %arg3[%c0_3, %c0_4] : memref<1x10xf32, #tpu.memory_space<vmem>>, vector<1x10xf32>
    %4 = vector.broadcast %3 : vector<1x10xf32> to vector<8x10xf32>
    %5 = arith.addf %2, %4 : vector<8x10xf32>
    %cst_5 = arith.constant 0.000000e+00 : f32
    %6 = vector.broadcast %cst_5 : f32 to vector<8x10xf32>
    %7 = arith.maximumf %5, %6 : vector<8x10xf32>
    %c0_6 = arith.constant 0 : index
    %c0_7 = arith.constant 0 : index
    %8 = vector.load %arg4[%c0_6, %c0_7] : memref<10x5xf32, #tpu.memory_space<vmem>>, vector<10x5xf32>
    %cst_8 = arith.constant dense<0.000000e+00> : vector<8x5xf32>
    %9 = tpu.matmul %7, %8, %cst_8 {dimension_numbers = #tpu.dot_dimension_numbers<[1], [0], [0], [1], [0, 0, 1, 1], [], []>} : vector<8x10xf32>, vector<10x5xf32>, vector<8x5xf32> -> vector<8x5xf32>
    %c0_9 = arith.constant 0 : index
    %c0_10 = arith.constant 0 : index
    %10 = vector.load %arg5[%c0_9, %c0_10] : memref<1x5xf32, #tpu.memory_space<vmem>>, vector<1x5xf32>
    %11 = vector.broadcast %10 : vector<1x5xf32> to vector<8x5xf32>
    %12 = arith.addf %9, %11 : vector<8x5xf32>
    %c0_11 = arith.constant 0 : index
    %c0_12 = arith.constant 0 : index
    %13 = vector.load %arg6[%c0_11, %c0_12] : memref<8x5xf32, #tpu.memory_space<vmem>>, vector<8x5xf32>
    tpu.vector_store %arg6[%c0_11, %c0_12], %12 {strides = array<i32>} : memref<8x5xf32, #tpu.memory_space<vmem>>, vector<8x5xf32>,
    return
  }
  func.func @transform_0(%arg0: i32) -> (i32, i32) {
    %c0_i32 = arith.constant 0 : i32
    %c0_i32_0 = arith.constant 0 : i32
    return %arg0, %c0_i32 : i32, i32
  }
  func.func @transform_1(%arg0: i32) -> (i32, i32) {
    %c0_i32 = arith.constant 0 : i32
    %c0_i32_0 = arith.constant 0 : i32
    %c0_i32_1 = arith.constant 0 : i32
    return %c0_i32, %c0_i32_0 : i32, i32
  }
  func.func @transform_2(%arg0: i32) -> (i32, i32) {
    %c0_i32 = arith.constant 0 : i32
    %c0_i32_0 = arith.constant 0 : i32
    %c0_i32_1 = arith.constant 0 : i32
    return %c0_i32, %c0_i32_0 : i32, i32
  }
  func.func @transform_3(%arg0: i32) -> (i32, i32) {
    %c0_i32 = arith.constant 0 : i32
    %c0_i32_0 = arith.constant 0 : i32
    %c0_i32_1 = arith.constant 0 : i32
    return %c0_i32, %c0_i32_0 : i32, i32
  }
  func.func @transform_4(%arg0: i32) -> (i32, i32) {
    %c0_i32 = arith.constant 0 : i32
    %c0_i32_0 = arith.constant 0 : i32
    %c0_i32_1 = arith.constant 0 : i32
    return %c0_i32, %c0_i32_0 : i32, i32
  }
  func.func @transform_5(%arg0: i32) -> (i32, i32) {
    %c0_i32 = arith.constant 0 : i32
    %c0_i32_0 = arith.constant 0 : i32
    return %arg0, %c0_i32 : i32, i32
  }
}

</mosaic_0001>

<bundles_post_ra>
// kernel: tpu_custom_call.1
= control target key start
LH: loop header
LB: loop body
LE: loop exit
PB: predicated region body
PF: predicated region fallthrough
CT: control target
= control target key end

     0   :  { %vm32_vm0 = vcmask 1041408   ;;  %vm28_vm1 = vcmask 80896   ;;  %s195_s0 = inlined_call_operand.vmem [shape: f32[8,10], index: 0, kind: input, shape index: {}]   ;;  %s196_s1 = inlined_call_operand.vmem [shape: f32[10,10], index: 1, kind: input, shape index: {}]   ;;  %s197_s2 = inlined_call_operand.vmem [shape: f32[1,10], index: 2, kind: input, shape index: {}]   ;;  %s198_s3 = inlined_call_operand.vmem [shape: f32[10,5], index: 3, kind: input, shape index: {}]   ;;  %s199_s4 = inlined_call_operand.vmem [shape: f32[1,5], index: 4, kind: input, shape index: {}]   ;;  %s200_s5 = inlined_call_operand.hbm [shape: f32[8,5], index: 5, kind: output, shape index: {}]  }
   0x1   :  { %v23_v0 = vld [vmem:[%s196_s1 + $0x8] sm:$0x3]  ;;  %v22_v1 = vld [vmem:[%s196_s1] sm:$0xff] }
   0x2   :  { %107 = vmatpush.msk.msra.mxu0 %vm32_vm0, %v23_v0  ;;  %v21_v2 = vld [vmem:[%s195_s0] sm:$0xff] }
   0x3   :  { %10 = vsyncpa [#allocation3], 0  ;;  %v58_v3 = vld [vmem:[%s198_s3 + $0x8] sm:$0x3]  ;;  %v57_v4 = vld [vmem:[%s198_s3] sm:$0xff]  ;;  %s140_s30 = smov [#allocation2]  }
   0x4   :  { %51 = vmatpush.msra.mxu0 %v22_v1  ;;  %109 = vmatpush.msk.msra.mxu1 %vm32_vm0, %v58_v3  ;;  %v112_v5 = vld [vmem:[%s197_s2] ss:$0 sm:$0xff]  ;;  %s96_s6 = sshll.u32 %s140_s30, 4  ;;  %s98_s9 = sshll.u32 %s200_s5, 4  ;;  %vm89_vm2 = vcmask 39936   ;;  %s97_s6 = int_to_ptr.vmem [resolvable:$true] %s96_s6  ;;  %s99_s9 = int_to_ptr.hbm [resolvable:$true] %s98_s9 }
   0x5   :  { %108 = vmatmul.msk.f32.vlgmr.msra.gmra.mxu0 %vm28_vm1, %v21_v2  ;;  %v113_v9 = vld [vmem:[%s199_s4] ss:$0 sm:$0xff] }
   0x6   :  { %84 = vmatpush.msra.mxu1 %v57_v4 }
  0x82   :  { %v53_v6 = vpop.f32.mrf.mxu0 }
  0x83   :  { %v54_v7 = vadd.f32 %v112_v5, %v53_v6 }
  0x85   :  { %v56_v8 = vmax.f32 %v54_v7, 0.0 }
  0x87   :  { %110 = vmatmul.msk.f32.vlgmr.msra.gmra.mxu1 %vm28_vm1, %v56_v8 }
 0x104   :  { %v86_v10 = vpop.f32.mrf.mxu1 }
 0x105   :  { %v87_v11 = vadd.f32 %v113_v9, %v86_v10 }
 0x107   :  { %90 = vst.msk [vmem:[#allocation2] sm:$0xff] %vm89_vm2, %v87_v11 }
 0x108   :  { %101 = dma.vmem_to_hbm [thread:$0]  %s97_s6, 128, %s99_s9, [#allocation3]  }
 0x109   :  { %138 = dma.done.wait [#allocation3], 128  }
 0x10a   :  { %139 = vsyncadd [#allocation3], 4294967168 }
 0x10b   :  { %106 = vsyncpa [#allocation3], 1 }

</bundles_post_ra>
